<compile_context>
chip_gen: v7x
topology: tpu7x:2x2x1
jax: 0.10.0
libtpu: 0.0.40
codegen_flags: <defaults>
</compile_context>

<pallas_src>
from functools import partial

import numpy as np
import jax
import jax.numpy as jnp
from jax.experimental import pallas as pl
from jax.experimental.pallas import tpu as pltpu


_OUT_BLOCK_BUDGET = 6 * 1024 * 1024      # bytes for one output block (Pallas double-buffers it)
_VMEM_LIMIT = 32 * 1024 * 1024           # fits v5e/v6e/v7x scoped VMEM


def build_position_table(embedding_size: int, max_seq_len: int = 512) -> np.ndarray:
    """Sinusoidal table WITHOUT the pad row: row t == embedding of position id t+1."""
    pos = np.arange(max_seq_len, dtype=np.float64)[:, None]
    i = np.arange(embedding_size, dtype=np.float64)[None, :]
    enc = pos / np.power(10000.0, 2.0 * i / embedding_size)
    enc[:, 1::2] = np.cos(enc[:, 1::2])
    enc[:, 0::2] = np.sin(enc[:, 0::2])
    return enc.astype(np.float32)


# ---------------------------------------------------------------------------- kernels

def _pos_emb_flat_kernel(seqlen_ref, table_ref, out_ref, *, emb):
    # seqlen_ref: VMEM (TB, 1)  int32
    # table_ref : VMEM (1, TLE) float32   (flattened (L, E) row-major)
    # out_ref   : VMEM (TB, TLE) float32  (lane-dense flattened output block)
    tb, tle = out_ref.shape
    j = pl.program_id(1) * tle + jax.lax.broadcasted_iota(jnp.int32, (tb, tle), 1)
    # flat index j = t*E + e is valid  <=>  t < seq_len  <=>  j < seq_len*E
    valid = (j < seqlen_ref[...] * emb).astype(jnp.float32)
    out_ref[...] = table_ref[...] * valid


def _pos_emb_mask_kernel(mask_ref, table_ref, out_ref):
    # mask_ref : VMEM (TB, TL, 1) float32  (validity already folded in host-side)
    # table_ref: VMEM (TL, E)     float32
    # out_ref  : VMEM (TB, TL, E) float32
    out_ref[...] = table_ref[...] * mask_ref[...]


# ------------------------------------------------------------------------ tile choosers

def _flat_tiles(batch, flat_len, itemsize=4, budget=_OUT_BLOCK_BUDGET):
    """(batch_tile, lane_tile) for a 2-D (batch, flat_len) output."""
    if batch * flat_len * itemsize <= budget:
        return batch, flat_len
    tb = (budget // max(1, flat_len * itemsize)) // 8 * 8      # multiple of 8 (layout rule)
    tb = min(tb, (batch // 8) * 8)
    if tb >= 8:
        return tb, flat_len
    tb = batch if batch < 8 else 8
    tle = max(128, (budget // (tb * itemsize)) // 128 * 128)   # multiple of 128 (lane rule)
    return tb, min(tle, flat_len)


def _mask_tiles(batch, length, emb, itemsize=4, budget=_OUT_BLOCK_BUDGET):
    """(batch_tile, length_tile) for a 3-D (batch, length, emb) output."""
    if batch * length * emb * itemsize <= budget:
        return batch, length
    row = length * emb * itemsize
    tb = (budget // max(1, row)) // 8 * 8
    tb = min(tb, (batch // 8) * 8)
    if tb >= 8:
        return tb, length
    tb = batch if batch < 8 else 8
    tl = max(8, (budget // (tb * emb * itemsize)) // 8 * 8)    # multiple of 8 (sublane rule)
    return tb, min(tl, length)


# ----------------------------------------------------------------------------- wrapper

def position_embedding_forward(table, sequence_len, is_mask: bool = False, max_len=None,
                               block_budget_bytes: int = _OUT_BLOCK_BUDGET):
    """
    table: (max_seq_len, E) float32 sinusoidal table WITHOUT the pad row.
    sequence_len: is_mask=False -> int array [B] of true lengths
                  is_mask=True  -> 0/1 mask [B, padded_len]
    max_len: static int; strongly preferred (avoids a host sync / per-length recompiles).
    Returns float32 [B, max_len, E].
    """
    table = jnp.asarray(table, jnp.float32)
    max_seq_len, emb = table.shape

    if is_mask:
        mask = jnp.asarray(sequence_len, jnp.float32)
        seq_len = jnp.sum(mask, axis=1).astype(jnp.int32)            # [B]
        if max_len is None:
            # Static padded length (no host sync). Positions past max(seq_len) are zeros,
            # matching the torch values (shape may be wider than torch's dynamic max).
            max_len = int(mask.shape[1])
    else:
        mask = None
        seq_len = jnp.asarray(sequence_len).astype(jnp.int32)        # [B]
        if max_len is None:
            # Fallback: forces a device->host sync + recompile per distinct L. Prefer static.
            max_len = int(jax.device_get(jnp.max(seq_len)))

    L = int(max_len)
    B = int(seq_len.shape[0])
    assert 1 <= L <= max_seq_len, "max_len must be in [1, max_seq_len]"

    tab = table if L == max_seq_len else table[:L]                   # row-0 aligned static slice

    if not is_mask:
        # ---- lane-dense flattened path: out (B, L*E), single multiply, no mask stream ----
        LE = L * emb
        TB, TLE = _flat_tiles(B, LE, budget=block_budget_bytes)
        grid = (pl.cdiv(B, TB), pl.cdiv(LE, TLE))
        table_flat = tab.reshape(1, LE)
        seq2d = seq_len.reshape(B, 1)

        out_flat = pl.pallas_call(
            partial(_pos_emb_flat_kernel, emb=emb),
            out_shape=jax.ShapeDtypeStruct((B, LE), jnp.float32),
            grid_spec=pltpu.PrefetchScalarGridSpec(
                num_scalar_prefetch=0,
                grid=grid,
                in_specs=[
                    pl.BlockSpec((TB, 1), lambda b, j: (b, 0)),      # seq_len
                    pl.BlockSpec((1, TLE), lambda b, j: (0, j)),     # flattened table
                ],
                out_specs=pl.BlockSpec((TB, TLE), lambda b, j: (b, j)),
            ),
            compiler_params=pltpu.CompilerParams(
                dimension_semantics=("parallel", "parallel"),
                vmem_limit_bytes=_VMEM_LIMIT),
        )(seq2d, table_flat)
        return out_flat.reshape(B, L, emb)

    # ---- mask path: fold validity into the mask once host-side (B*L floats), then one
    #      broadcast multiply in the kernel. Supports arbitrary (non-left-aligned) masks. ----
    t = jnp.arange(L, dtype=jnp.int32)[None, :]
    mask_c = (mask[:, :L] * (t < seq_len[:, None]).astype(jnp.float32))[:, :, None]  # (B, L, 1)

    TB, TL = _mask_tiles(B, L, emb, budget=block_budget_bytes)
    grid = (pl.cdiv(B, TB), pl.cdiv(L, TL))

    out = pl.pallas_call(
        _pos_emb_mask_kernel,
        out_shape=jax.ShapeDtypeStruct((B, L, emb), jnp.float32),
        grid_spec=pltpu.PrefetchScalarGridSpec(
            num_scalar_prefetch=0,
            grid=grid,
            in_specs=[
                pl.BlockSpec((TB, TL, 1), lambda b, l: (b, l, 0)),   # combined mask
                pl.BlockSpec((TL, emb), lambda b, l: (l, 0)),        # table rows
            ],
            out_specs=pl.BlockSpec((TB, TL, emb), lambda b, l: (b, l, 0)),
        ),
        compiler_params=pltpu.CompilerParams(
            dimension_semantics=("parallel", "parallel"),
            vmem_limit_bytes=_VMEM_LIMIT),
    )(mask_c, tab)
    return out


# --------------------------------------------------------------------------- reference

def _reference(table_np, sequence_len_np, is_mask=False, max_len=None):
    """Pure numpy mirror of the PyTorch forward (table_np has NO pad row)."""
    tab = np.concatenate([np.zeros((1, table_np.shape[1]), np.float32), table_np], axis=0)
    if is_mask:
        mask = np.asarray(sequence_len_np, np.float32)
        seq_len = mask.sum(axis=1).astype(np.int64)
    else:
        mask = None
        seq_len = np.asarray(sequence_len_np).astype(np.int64)
    if max_len is None:
        max_len = int(seq_len.max())
    ids = np.stack(
        [np.array(list(range(1, int(s) + 1)) + [0] * (max_len - int(s)), dtype=np.int64)
         for s in seq_len])
    out = tab[ids]                                                   # (B, max_len, E)
    if is_mask:
        out = out * mask[:, :max_len, None]
    return out.astype(np.float32)


if __name__ == "__main__":
    embedding_size = 32
    max_seq_len = 16
    table_np = build_position_table(embedding_size, max_seq_len)     # (16, 32), no pad row
    table = jnp.asarray(table_np)

    key = jax.random.PRNGKey(0)
    k1, k2, k3 = jax.random.split(key, 3)

    # Case 1: is_mask=False, B=2, static max_len (no host sync inside the wrapper).
    seq_len_np = np.asarray(jax.random.randint(k1, (2,), 1, max_seq_len + 1), dtype=np.int32)
    out1 = jax.block_until_ready(
        position_embedding_forward(table, jnp.asarray(seq_len_np), is_mask=False,
                                   max_len=int(seq_len_np.max())))
    ref1 = _reference(table_np, seq_len_np, is_mask=False, max_len=int(seq_len_np.max()))
    assert out1.shape == ref1.shape
    np.testing.assert_allclose(np.asarray(out1), ref1, rtol=1e-6, atol=1e-6)

    # Case 2: is_mask=True, left-aligned mask, max_len=None (static padded length).
    mask_np = np.array([[1, 1, 1, 0, 0, 0, 0, 0],
                        [1, 1, 1, 1, 1, 1, 1, 1]], dtype=np.float32)
    out2 = jax.block_until_ready(
        position_embedding_forward(table, jnp.asarray(mask_np), is_mask=True))
    ref2 = _reference(table_np, mask_np, is_mask=True)
    assert out2.shape == ref2.shape
    np.testing.assert_allclose(np.asarray(out2), ref2, rtol=1e-6, atol=1e-6)

    # Case 3: is_mask=False, B=16, tiny block budget -> exercises the (batch, lane) tiling grid.
    seq_len3 = np.asarray(jax.random.randint(k2, (16,), 1, max_seq_len + 1), dtype=np.int32)
    out3 = jax.block_until_ready(
        position_embedding_forward(table, jnp.asarray(seq_len3), is_mask=False,
                                   max_len=max_seq_len, block_budget_bytes=4096))
    ref3 = _reference(table_np, seq_len3, is_mask=False, max_len=max_seq_len)
    assert out3.shape == ref3.shape
    np.testing.assert_allclose(np.asarray(out3), ref3, rtol=1e-6, atol=1e-6)

    # Case 4: is_mask=True, B=16, random non-left-aligned 0/1 mask, tiled (batch, length) grid.
    mask4 = (jax.random.uniform(k3, (16, max_seq_len)) < 0.5).astype(jnp.float32)
    out4 = jax.block_until_ready(
        position_embedding_forward(table, mask4, is_mask=True,
                                   max_len=max_seq_len, block_budget_bytes=4096))
    ref4 = _reference(table_np, np.asarray(mask4), is_mask=True, max_len=max_seq_len)
    assert out4.shape == ref4.shape
    np.testing.assert_allclose(np.asarray(out4), ref4, rtol=1e-6, atol=1e-6)

    print("KERNEL_OK")
</pallas_src>

<mosaic_0001>
module attributes {stable_mosaic.version = 11 : i64} {
  func.func @_pos_emb_flat_kernel(%arg0: i32, %arg1: i32, %arg2: memref<2x1xi32, #tpu.memory_space<vmem>>, %arg3: memref<1x512xf32, #tpu.memory_space<vmem>>, %arg4: memref<2x512xf32, #tpu.memory_space<vmem>>) attributes {dimension_semantics = [#tpu.dimension_semantics<parallel>, #tpu.dimension_semantics<parallel>], iteration_bounds = array<i64: 1, 1>, scalar_prefetch = 0 : i64, scratch_operands = 0 : i64, tpu.core_type = #tpu.core_type<tc>, window_params = [{transform_indices = @transform_0, window_bounds = array<i64: 2, 1>}, {transform_indices = @transform_1, window_bounds = array<i64: 1, 512>}, {transform_indices = @transform_2, window_bounds = array<i64: 2, 512>}]} {
    %c512_i32 = arith.constant 512 : i32
    %0 = arith.muli %arg1, %c512_i32 : i32
    %1 = tpu.iota {dimensions = array<i32: 1>} : vector<2x512xi32>
    %2 = vector.broadcast %0 : i32 to vector<2x512xi32>
    %3 = arith.addi %2, %1 : vector<2x512xi32>
    %c0 = arith.constant 0 : index
    %c0_0 = arith.constant 0 : index
    %4 = vector.load %arg2[%c0, %c0_0] : memref<2x1xi32, #tpu.memory_space<vmem>>, vector<2x1xi32>
    %c32_i32 = arith.constant 32 : i32
    %5 = vector.broadcast %c32_i32 : i32 to vector<2x1xi32>
    %6 = arith.muli %4, %5 : vector<2x1xi32>
    %7 = vector.broadcast %6 : vector<2x1xi32> to vector<2x512xi32>
    %8 = arith.cmpi slt, %3, %7 : vector<2x512xi32>
    %9 = arith.extui %8 : vector<2x512xi1> to vector<2x512xi32>
    %10 = arith.sitofp %9 : vector<2x512xi32> to vector<2x512xf32>
    %c0_1 = arith.constant 0 : index
    %c0_2 = arith.constant 0 : index
    %11 = vector.load %arg3[%c0_1, %c0_2] : memref<1x512xf32, #tpu.memory_space<vmem>>, vector<1x512xf32>
    %12 = vector.broadcast %11 : vector<1x512xf32> to vector<2x512xf32>
    %13 = arith.mulf %12, %10 : vector<2x512xf32>
    %c0_3 = arith.constant 0 : index
    %c0_4 = arith.constant 0 : index
    %14 = vector.load %arg4[%c0_3, %c0_4] : memref<2x512xf32, #tpu.memory_space<vmem>>, vector<2x512xf32>
    tpu.vector_store %arg4[%c0_3, %c0_4], %13 {strides = array<i32>} : memref<2x512xf32, #tpu.memory_space<vmem>>, vector<2x512xf32>,
    return
  }
  func.func @transform_0(%arg0: i32, %arg1: i32) -> (i32, i32) {
    %c0_i32 = arith.constant 0 : i32
    %c0_i32_0 = arith.constant 0 : i32
    return %arg0, %c0_i32 : i32, i32
  }
  func.func @transform_1(%arg0: i32, %arg1: i32) -> (i32, i32) {
    %c0_i32 = arith.constant 0 : i32
    %c0_i32_0 = arith.constant 0 : i32
    return %c0_i32, %arg1 : i32, i32
  }
  func.func @transform_2(%arg0: i32, %arg1: i32) -> (i32, i32) {
    %c0_i32 = arith.constant 0 : i32
    return %arg0, %arg1 : i32, i32
  }
}

</mosaic_0001>

<bundles_post_ra>
// kernel: tpu_custom_call.1
= control target key start
LH: loop header
LB: loop body
LE: loop exit
PB: predicated region body
PF: predicated region fallthrough
CT: control target
= control target key end

     0   :  { %v136_v1 = vmov 0   ;;  %s173_s0 = inlined_call_operand.vmem [shape: s32[2,1], index: 0, kind: input, shape index: {}]   ;;  %s174_s1 = inlined_call_operand.vmem [shape: f32[1,512], index: 1, kind: input, shape index: {}]   ;;  %s175_s2 = inlined_call_operand.hbm [shape: f32[2,512], index: 2, kind: output, shape index: {}]  }
   0x1   :  { %v23_v0 = vld [vmem:[%s173_s0] sm:$0x3]  ;;  %111 = vset.pattern.permute.xlu0 %v136_v1 }
   0x2   :  { %v24_v2 = vmul.u32 32, %v23_v0 }
   0x3   :  { %7 = vsyncpa [#allocation3], 0  ;;  %v13_v3 = vlaneseq  ;;  %v137_v5 = vmov 1983009808   ;;  %v40_v12 = vld [vmem:[%s174_s1] sm:$0xf] }
   0x4   :  { %26 = vperm.xlu0 %111, %v24_v2   ;;  %v73_v6 = vunpack.c.l.s4 %v137_v5  ;;  %v138_v23 = vmov 0.0   ;;  %s139_s0 = smov [#allocation2]  }
   0x5   :  { %v43_v4 = vshrl.u32 %v13_v3, 7  ;;  %v14_v7 = vand.u32 127, %v13_v3  ;;  %s95_s1 = sshll.u32 %s139_s0, 4  ;;  %s96_s1 = int_to_ptr.vmem [resolvable:$true] %s95_s1 }
   0x6   :  { %v74_v13 = vunpack.c.0.s8 %v73_v6  ;;  %s112_s13 = scalar_lea.vmem %s96_s1, 128  ;;  %p117_p1 = scmp.lt.s32.totalorder %s96_s1, %s96_s1 }
   0x7   :  { %v44_v8 = vsub.s32 0, %v43_v4  ;;  %v48_v9 = vsub.s32 1, %v43_v4  ;;  %v52_v10 = vsub.s32 2, %v43_v4  ;;  %v56_v11 = vsub.s32 3, %v43_v4  ;;  %p113_p0 = scmp.ne.s32.totalorder %s96_s1, %s112_s13  ;;  %p118_p2 = scmp.lt.s32.totalorder %s112_s13, %s112_s13 }
   0x8   :  { %v15_v14 = vadd.s32 128, %v14_v7  ;;  %v16_v15 = vadd.s32 256, %v14_v7  ;;  %v17_v16 = vadd.s32 384, %v14_v7  ;;  %v77_v22 = vsub.s32 %v74_v13, %v43_v4 }
   0x9   :  { %v45_v17 = vrot.slane %v40_v12, %v44_v8  ;;  %v49_v18 = vrot.slane %v40_v12, %v48_v9  ;;  %v53_v19 = vrot.slane %v40_v12, %v52_v10  ;;  %v57_v20 = vrot.slane %v40_v12, %v56_v11  ;;  %p119_p3 = por %p118_p2, %p117_p1 }
   0xb   :  { %p120_p4 = pnand %p119_p3, %p113_p0 }
  0x83   :  { %v27_v21 = vpop.permute.xlu0 %26 }
  0x84   :  { %vm28_vm0 = vcmp.lt.s32.totalorder %v14_v7, %v27_v21  ;;  %vm29_vm1 = vcmp.lt.s32.totalorder %v15_v14, %v27_v21  ;;  %vm30_vm2 = vcmp.lt.s32.totalorder %v16_v15, %v27_v21  ;;  %vm31_vm3 = vcmp.lt.s32.totalorder %v17_v16, %v27_v21 }
  0x85   :  { %v103_v24 = vsel %vm28_vm0, 1.0, %v138_v23  ;;  %v104_v25 = vsel %vm29_vm1, 1.0, %v138_v23  ;;  %v105_v26 = vsel %vm30_vm2, 1.0, %v138_v23  ;;  %v106_v27 = vsel %vm31_vm3, 1.0, %v138_v23 }
  0x86   :  { %v62_v28 = vmul.f32 %v103_v24, %v45_v17  ;;  %v63_v29 = vmul.f32 %v104_v25, %v49_v18  ;;  %v64_v30 = vmul.f32 %v105_v26, %v53_v19  ;;  %v65_v31 = vmul.f32 %v106_v27, %v57_v20 }
  0x88   :  { %v70_v32 = vcombine.low %v62_v28, %v63_v29  ;;  %v71_v33 = vcombine.low %v64_v30, %v65_v31 }
  0x8a   :  { %v78_v34 = vrot.slane %v70_v32, %v77_v22  ;;  %v85_v35 = vrot.slane %v71_v33, %v77_v22 }
  0x8c   :  { %v86_v36 = vcombine.low %v78_v34, %v85_v35 }
  0x8e   :  { %88 = vst [vmem:[#allocation2] sm:$0xff] %v86_v36 }
  0x8f   :  { %123 = shalt.err (!%p120_p4)
}
  0x90   :  { %s124_s16 = scalar_lea.hbm %s175_s2, 128 }
  0x91   :  { %p125_p5 = scmp.ne.s32.totalorder %s175_s2, %s124_s16  ;;  %p128_p6 = scmp.lt.u32.totalorder %s124_s16, %s175_s2 }
  0x93   :  { %p130_p7 = pnand %p128_p6, %p125_p5 }
  0x95   :  { %133 = shalt.err (!%p130_p7)
}
  0x96   :  { %98 = dma.vmem_to_hbm [thread:$0]  %s96_s1, 128, %s175_s2, [#allocation3]  }
  0x97   :  { %134 = dma.done.wait [#allocation3], 128  }
  0x98   :  { %135 = vsyncadd [#allocation3], 4294967168 }
  0x99   :  { %102 = vsyncpa [#allocation3], 1 }

</bundles_post_ra>
